<compile_context>
chip_gen: v6e
topology: v6e:2x2x1
jax: 0.10.0
libtpu: 0.0.40
codegen_flags: <defaults>
</compile_context>

<pallas_src>
import functools

import jax
import jax.numpy as jnp
from jax import lax
from jax.experimental import pallas as pl
from jax.experimental.pallas import tpu as pltpu

LANE = 128


def _round_up(x, m):
    return (x + m - 1) // m * m


def actor_critic_kernel(x_ref, w1_ref, b1_ref, w2_ref, b2_ref, wh_ref, bh_ref,
                        out_ref, *, output_dim):
    """x_ref: (TB, Din) bf16. w*: bf16, b*: f32. out_ref: (TB, 128) f32 slab."""
    x = x_ref[...]

    # body: Linear -> ReLU -> Linear -> ReLU   (MXU in bf16, f32 accumulate + f32 elementwise)
    h1 = jnp.dot(x, w1_ref[...], preferred_element_type=jnp.float32) + b1_ref[...]
    h1 = jnp.maximum(h1, 0.0).astype(jnp.bfloat16)
    h2 = jnp.dot(h1, w2_ref[...], preferred_element_type=jnp.float32) + b2_ref[...]
    h2 = jnp.maximum(h2, 0.0).astype(jnp.bfloat16)

    # fused policy+value head: one matmul, lanes [0, output_dim) = policy logits,
    # lane output_dim = value, remaining lanes = 0.
    y = jnp.dot(h2, wh_ref[...], preferred_element_type=jnp.float32) + bh_ref[...]

    lane = lax.broadcasted_iota(jnp.int32, y.shape, 1)
    is_policy = lane < output_dim

    # softmax over the policy lanes only (padded lanes masked to -inf -> exp 0).
    # Exact division so probs sum to 1 to f32 rounding.
    logits = jnp.where(is_policy, y, -jnp.inf)
    m = jnp.max(logits, axis=1, keepdims=True)
    e = jnp.exp(logits - m)
    denom = jnp.sum(e, axis=1, keepdims=True)
    probs = e / denom

    # probs is already 0 on non-policy lanes; add the value into its lane, zeros elsewhere.
    out_ref[...] = probs + jnp.where(lane == output_dim, y, 0.0)


def pack_params(raw):
    """raw holds (in, out)-layout f32 weights w1,b1,w2,b2,wp,bp,wv,bv (PyTorch W transposed).
    Returns padded / fused / bf16-cast tensors for the kernel."""
    w1, b1 = raw["w1"], raw["b1"]
    w2, b2 = raw["w2"], raw["b2"]
    wp, bp = raw["wp"], raw["bp"]
    wv, bv = raw["wv"], raw["bv"]

    din, hid = w1.shape
    out_dim = wp.shape[1]
    hid_pad = _round_up(hid, LANE)
    head_pad = _round_up(out_dim + 1, LANE)

    w1p = jnp.zeros((din, hid_pad), jnp.float32).at[:, :hid].set(w1)
    b1p = jnp.zeros((1, hid_pad), jnp.float32).at[:, :hid].set(b1.reshape(1, -1))
    w2p = jnp.zeros((hid_pad, hid_pad), jnp.float32).at[:hid, :hid].set(w2)
    b2p = jnp.zeros((1, hid_pad), jnp.float32).at[:, :hid].set(b2.reshape(1, -1))

    wh = jnp.zeros((hid_pad, head_pad), jnp.float32)
    wh = wh.at[:hid, :out_dim].set(wp).at[:hid, out_dim].set(wv[:, 0])
    bh = jnp.zeros((1, head_pad), jnp.float32)
    bh = bh.at[:, :out_dim].set(bp.reshape(1, -1)).at[:, out_dim].set(bv.reshape(()))

    return dict(
        w1=w1p.astype(jnp.bfloat16), b1=b1p,
        w2=w2p.astype(jnp.bfloat16), b2=b2p,
        wh=wh.astype(jnp.bfloat16), bh=bh,
    )


def actor_critic_forward(x, packed, output_dim, *, block_b=512):
    """x: (B, input_dim) f32.  Returns (probs (B, output_dim) f32, value (B, 1) f32)."""
    B, din = x.shape
    hid_pad = packed["w1"].shape[1]
    head_pad = packed["wh"].shape[1]

    # batch tiling (multiple of 16 for bf16 sublane packing); pad B to a whole number of tiles
    TB = min(_round_up(B, 16), block_b)
    B_pad = _round_up(B, TB)
    if B_pad != B:
        x = jnp.pad(x, ((0, B_pad - B), (0, 0)))
    x = x.astype(jnp.bfloat16)

    resident = lambda i: (0, 0)   # weights/biases: same block every grid step -> stay in VMEM

    out = pl.pallas_call(
        functools.partial(actor_critic_kernel, output_dim=output_dim),
        out_shape=jax.ShapeDtypeStruct((B_pad, head_pad), jnp.float32),
        grid=(B_pad // TB,),
        in_specs=[
            pl.BlockSpec((TB, din), lambda i: (i, 0)),        # x tile
            pl.BlockSpec((din, hid_pad), resident),           # w1
            pl.BlockSpec((1, hid_pad), resident),             # b1
            pl.BlockSpec((hid_pad, hid_pad), resident),       # w2
            pl.BlockSpec((1, hid_pad), resident),             # b2
            pl.BlockSpec((hid_pad, head_pad), resident),      # fused head weight
            pl.BlockSpec((1, head_pad), resident),            # fused head bias
        ],
        out_specs=pl.BlockSpec((TB, head_pad), lambda i: (i, 0)),
        compiler_params=pltpu.CompilerParams(
            dimension_semantics=("parallel",)),                # shard batch across TCs (v7x)
    )(x, packed["w1"], packed["b1"], packed["w2"], packed["b2"],
      packed["wh"], packed["bh"])

    out = out[:B]
    probs = out[:, :output_dim]
    value = out[:, output_dim:output_dim + 1]
    return probs, value


def init_params(key, input_dim, output_dim, hidden_dim):
    """Deterministic init mirroring PyTorch Linear (uniform +/- 1/sqrt(fan_in)),
    stored transposed as (in, out) for x @ W."""
    ks = jax.random.split(key, 8)

    def lin(kw, kb, fan_in, fan_out):
        bound = 1.0 / jnp.sqrt(fan_in)
        w = jax.random.uniform(kw, (fan_in, fan_out), jnp.float32, -bound, bound)
        b = jax.random.uniform(kb, (fan_out,), jnp.float32, -bound, bound)
        return w, b

    w1, b1 = lin(ks[0], ks[1], input_dim, hidden_dim)
    w2, b2 = lin(ks[2], ks[3], hidden_dim, hidden_dim)
    wp, bp = lin(ks[4], ks[5], hidden_dim, output_dim)
    wv, bv = lin(ks[6], ks[7], hidden_dim, 1)
    return dict(w1=w1, b1=b1, w2=w2, b2=b2, wp=wp, bp=bp, wv=wv, bv=bv)


def reference_forward(x, raw):
    """Pure-JAX reference mirroring the PyTorch module, with the same bf16 matmul
    operands / f32 accumulation the kernel uses."""
    def mm(a, w):
        return jnp.dot(a.astype(jnp.bfloat16), w.astype(jnp.bfloat16),
                       preferred_element_type=jnp.float32)

    h = jnp.maximum(mm(x, raw["w1"]) + raw["b1"], 0.0)
    h = jnp.maximum(mm(h, raw["w2"]) + raw["b2"], 0.0)
    logits = mm(h, raw["wp"]) + raw["bp"]
    probs = jax.nn.softmax(logits, axis=1)
    value = mm(h, raw["wv"]) + raw["bv"]
    return probs, value.reshape(-1, 1)


if __name__ == "__main__":
    input_dim, output_dim, hidden_dim = 16, 4, 32
    batch = 8

    key = jax.random.PRNGKey(0)
    k_x, k_p = jax.random.split(key)
    x = jax.random.normal(k_x, (batch, input_dim), jnp.float32)
    raw = init_params(k_p, input_dim, output_dim, hidden_dim)
    packed = pack_params(raw)

    probs, value = actor_critic_forward(x, packed, output_dim)
    jax.block_until_ready((probs, value))

    probs_ref, value_ref = reference_forward(x, raw)

    assert probs.shape == (batch, output_dim)
    assert value.shape == (batch, 1)
    assert jnp.allclose(probs, probs_ref, atol=2e-3, rtol=2e-3), \
        f"probs mismatch: {jnp.max(jnp.abs(probs - probs_ref))}"
    assert jnp.allclose(value, value_ref, atol=2e-3, rtol=2e-2), \
        f"value mismatch: {jnp.max(jnp.abs(value - value_ref))}"
    assert jnp.allclose(jnp.sum(probs, axis=1), 1.0, atol=1e-3), \
        f"probs do not sum to 1: {jnp.max(jnp.abs(jnp.sum(probs, axis=1) - 1.0))}"

    print("KERNEL_OK")
</pallas_src>

<mosaic_0001>
module attributes {stable_mosaic.version = 11 : i64} {
  func.func @actor_critic_kernel(%arg0: i32, %arg1: memref<16x16xbf16, #tpu.memory_space<vmem>>, %arg2: memref<16x128xbf16, #tpu.memory_space<vmem>>, %arg3: memref<1x128xf32, #tpu.memory_space<vmem>>, %arg4: memref<128x128xbf16, #tpu.memory_space<vmem>>, %arg5: memref<1x128xf32, #tpu.memory_space<vmem>>, %arg6: memref<128x128xbf16, #tpu.memory_space<vmem>>, %arg7: memref<1x128xf32, #tpu.memory_space<vmem>>, %arg8: memref<16x128xf32, #tpu.memory_space<vmem>>) attributes {dimension_semantics = [#tpu.dimension_semantics<parallel>], iteration_bounds = array<i64: 1>, scalar_prefetch = 0 : i64, scratch_operands = 0 : i64, tpu.core_type = #tpu.core_type<tc>, window_params = [{transform_indices = @transform_0, window_bounds = array<i64: 16, 16>}, {pipeline_mode = #tpu.pipeline_mode<synchronous>, transform_indices = @transform_1, window_bounds = array<i64: 16, 128>}, {pipeline_mode = #tpu.pipeline_mode<synchronous>, transform_indices = @transform_2, window_bounds = array<i64: 1, 128>}, {pipeline_mode = #tpu.pipeline_mode<synchronous>, transform_indices = @transform_3, window_bounds = array<i64: 128, 128>}, {pipeline_mode = #tpu.pipeline_mode<synchronous>, transform_indices = @transform_4, window_bounds = array<i64: 1, 128>}, {pipeline_mode = #tpu.pipeline_mode<synchronous>, transform_indices = @transform_5, window_bounds = array<i64: 128, 128>}, {pipeline_mode = #tpu.pipeline_mode<synchronous>, transform_indices = @transform_6, window_bounds = array<i64: 1, 128>}, {transform_indices = @transform_7, window_bounds = array<i64: 16, 128>}]} {
    %c0 = arith.constant 0 : index
    %c0_0 = arith.constant 0 : index
    %0 = vector.load %arg1[%c0, %c0_0] : memref<16x16xbf16, #tpu.memory_space<vmem>>, vector<16x16xbf16>
    %c0_1 = arith.constant 0 : index
    %c0_2 = arith.constant 0 : index
    %1 = vector.load %arg2[%c0_1, %c0_2] : memref<16x128xbf16, #tpu.memory_space<vmem>>, vector<16x128xbf16>
    %cst = arith.constant dense<0.000000e+00> : vector<16x128xf32>
    %2 = tpu.matmul %0, %1, %cst {dimension_numbers = #tpu.dot_dimension_numbers<[1], [0], [0], [1], [0, 0, 1, 1], [], []>} : vector<16x16xbf16>, vector<16x128xbf16>, vector<16x128xf32> -> vector<16x128xf32>
    %c0_3 = arith.constant 0 : index
    %c0_4 = arith.constant 0 : index
    %3 = vector.load %arg3[%c0_3, %c0_4] : memref<1x128xf32, #tpu.memory_space<vmem>>, vector<1x128xf32>
    %4 = vector.broadcast %3 : vector<1x128xf32> to vector<16x128xf32>
    %5 = arith.addf %2, %4 : vector<16x128xf32>
    %cst_5 = arith.constant 0.000000e+00 : f32
    %6 = vector.broadcast %cst_5 : f32 to vector<16x128xf32>
    %7 = arith.maximumf %5, %6 : vector<16x128xf32>
    %8 = arith.truncf %7 : vector<16x128xf32> to vector<16x128xbf16>
    %c0_6 = arith.constant 0 : index
    %c0_7 = arith.constant 0 : index
    %9 = vector.load %arg4[%c0_6, %c0_7] : memref<128x128xbf16, #tpu.memory_space<vmem>>, vector<128x128xbf16>
    %cst_8 = arith.constant dense<0.000000e+00> : vector<16x128xf32>
    %10 = tpu.matmul %8, %9, %cst_8 {dimension_numbers = #tpu.dot_dimension_numbers<[1], [0], [0], [1], [0, 0, 1, 1], [], []>} : vector<16x128xbf16>, vector<128x128xbf16>, vector<16x128xf32> -> vector<16x128xf32>
    %c0_9 = arith.constant 0 : index
    %c0_10 = arith.constant 0 : index
    %11 = vector.load %arg5[%c0_9, %c0_10] : memref<1x128xf32, #tpu.memory_space<vmem>>, vector<1x128xf32>
    %12 = vector.broadcast %11 : vector<1x128xf32> to vector<16x128xf32>
    %13 = arith.addf %10, %12 : vector<16x128xf32>
    %cst_11 = arith.constant 0.000000e+00 : f32
    %14 = vector.broadcast %cst_11 : f32 to vector<16x128xf32>
    %15 = arith.maximumf %13, %14 : vector<16x128xf32>
    %16 = arith.truncf %15 : vector<16x128xf32> to vector<16x128xbf16>
    %c0_12 = arith.constant 0 : index
    %c0_13 = arith.constant 0 : index
    %17 = vector.load %arg6[%c0_12, %c0_13] : memref<128x128xbf16, #tpu.memory_space<vmem>>, vector<128x128xbf16>
    %cst_14 = arith.constant dense<0.000000e+00> : vector<16x128xf32>
    %18 = tpu.matmul %16, %17, %cst_14 {dimension_numbers = #tpu.dot_dimension_numbers<[1], [0], [0], [1], [0, 0, 1, 1], [], []>} : vector<16x128xbf16>, vector<128x128xbf16>, vector<16x128xf32> -> vector<16x128xf32>
    %c0_15 = arith.constant 0 : index
    %c0_16 = arith.constant 0 : index
    %19 = vector.load %arg7[%c0_15, %c0_16] : memref<1x128xf32, #tpu.memory_space<vmem>>, vector<1x128xf32>
    %20 = vector.broadcast %19 : vector<1x128xf32> to vector<16x128xf32>
    %21 = arith.addf %18, %20 : vector<16x128xf32>
    %22 = tpu.iota {dimensions = array<i32: 1>} : vector<16x128xi32>
    %c4_i32 = arith.constant 4 : i32
    %23 = vector.broadcast %c4_i32 : i32 to vector<16x128xi32>
    %24 = arith.cmpi slt, %22, %23 : vector<16x128xi32>
    %cst_17 = arith.constant 0xFF800000 : f32
    %25 = vector.broadcast %cst_17 : f32 to vector<16x128xf32>
    %26 = arith.select %24, %21, %25 : vector<16x128xi1>, vector<16x128xf32>
    %cst_18 = arith.constant dense<0xFF800000> : vector<16xf32>
    %27 = vector.multi_reduction <maximumf>, %26, %cst_18 [1] : vector<16x128xf32> to vector<16xf32>
    %28 = vector.shape_cast %27 : vector<16xf32> to vector<16x1xf32>
    %29 = vector.broadcast %28 : vector<16x1xf32> to vector<16x128xf32>
    %30 = arith.subf %26, %29 : vector<16x128xf32>
    %31 = math.exp %30 : vector<16x128xf32>
    %cst_19 = arith.constant dense<0.000000e+00> : vector<16xf32>
    %32 = vector.multi_reduction <add>, %31, %cst_19 [1] : vector<16x128xf32> to vector<16xf32>
    %33 = vector.shape_cast %32 : vector<16xf32> to vector<16x1xf32>
    %34 = vector.broadcast %33 : vector<16x1xf32> to vector<16x128xf32>
    %35 = arith.divf %31, %34 : vector<16x128xf32>
    %c4_i32_20 = arith.constant 4 : i32
    %36 = vector.broadcast %c4_i32_20 : i32 to vector<16x128xi32>
    %37 = arith.cmpi eq, %22, %36 : vector<16x128xi32>
    %cst_21 = arith.constant 0.000000e+00 : f32
    %38 = vector.broadcast %cst_21 : f32 to vector<16x128xf32>
    %39 = arith.select %37, %21, %38 : vector<16x128xi1>, vector<16x128xf32>
    %40 = arith.addf %35, %39 : vector<16x128xf32>
    %c0_22 = arith.constant 0 : index
    %c0_23 = arith.constant 0 : index
    %41 = vector.load %arg8[%c0_22, %c0_23] : memref<16x128xf32, #tpu.memory_space<vmem>>, vector<16x128xf32>
    tpu.vector_store %arg8[%c0_22, %c0_23], %40 {strides = array<i32>} : memref<16x128xf32, #tpu.memory_space<vmem>>, vector<16x128xf32>,
    return
  }
  func.func @transform_0(%arg0: i32) -> (i32, i32) {
    %c0_i32 = arith.constant 0 : i32
    %c0_i32_0 = arith.constant 0 : i32
    return %arg0, %c0_i32 : i32, i32
  }
  func.func @transform_1(%arg0: i32) -> (i32, i32) {
    %c0_i32 = arith.constant 0 : i32
    %c0_i32_0 = arith.constant 0 : i32
    %c0_i32_1 = arith.constant 0 : i32
    return %c0_i32, %c0_i32_0 : i32, i32
  }
  func.func @transform_2(%arg0: i32) -> (i32, i32) {
    %c0_i32 = arith.constant 0 : i32
    %c0_i32_0 = arith.constant 0 : i32
    %c0_i32_1 = arith.constant 0 : i32
    return %c0_i32, %c0_i32_0 : i32, i32
  }
  func.func @transform_3(%arg0: i32) -> (i32, i32) {
    %c0_i32 = arith.constant 0 : i32
    %c0_i32_0 = arith.constant 0 : i32
    %c0_i32_1 = arith.constant 0 : i32
    return %c0_i32, %c0_i32_0 : i32, i32
  }
  func.func @transform_4(%arg0: i32) -> (i32, i32) {
    %c0_i32 = arith.constant 0 : i32
    %c0_i32_0 = arith.constant 0 : i32
    %c0_i32_1 = arith.constant 0 : i32
    return %c0_i32, %c0_i32_0 : i32, i32
  }
  func.func @transform_5(%arg0: i32) -> (i32, i32) {
    %c0_i32 = arith.constant 0 : i32
    %c0_i32_0 = arith.constant 0 : i32
    %c0_i32_1 = arith.constant 0 : i32
    return %c0_i32, %c0_i32_0 : i32, i32
  }
  func.func @transform_6(%arg0: i32) -> (i32, i32) {
    %c0_i32 = arith.constant 0 : i32
    %c0_i32_0 = arith.constant 0 : i32
    %c0_i32_1 = arith.constant 0 : i32
    return %c0_i32, %c0_i32_0 : i32, i32
  }
  func.func @transform_7(%arg0: i32) -> (i32, i32) {
    %c0_i32 = arith.constant 0 : i32
    %c0_i32_0 = arith.constant 0 : i32
    return %arg0, %c0_i32 : i32, i32
  }
}

</mosaic_0001>

<bundles_post_ra>
// kernel: tpu_custom_call.1
= control target key start
LH: loop header
LB: loop body
LE: loop exit
PB: predicated region body
PF: predicated region fallthrough
CT: control target
= control target key end

     0   :  { %12 = vsyncpa [#allocation3], 0  ;;  %s769_s0 = inlined_call_operand.hbm [shape: bf16[16,16], index: 0, kind: input, shape index: {}]   ;;  %s770_s1 = inlined_call_operand.hbm [shape: bf16[16,128], index: 1, kind: input, shape index: {}]   ;;  %s771_s2 = inlined_call_operand.vmem [shape: f32[1,128], index: 2, kind: input, shape index: {}]   ;;  %s772_s3 = inlined_call_operand.hbm [shape: bf16[128,128], index: 3, kind: input, shape index: {}]   ;;  %s773_s4 = inlined_call_operand.vmem [shape: f32[1,128], index: 4, kind: input, shape index: {}]   ;;  %s774_s5 = inlined_call_operand.hbm [shape: bf16[128,128], index: 5, kind: input, shape index: {}]   ;;  %s775_s6 = inlined_call_operand.vmem [shape: f32[1,128], index: 6, kind: input, shape index: {}]   ;;  %s776_s7 = inlined_call_operand.hbm [shape: f32[16,128], index: 7, kind: output, shape index: {}]  }
   0x1   :  { %13 = vsyncpa [#allocation6], 0 }
   0x2   :  { %14 = vsyncpa [#allocation9], 0 }
   0x3   :  { %15 = vsyncpa [#allocation4], 0  ;;  %s662_s24 = smov [#allocation5]   ;;  %s663_s26 = smov [#allocation2]  }
   0x4   :  { %s33_s25 = sshll.u32 %s662_s24, 4  ;;  %s21_s27 = sshll.u32 %s663_s26, 4  ;;  %s34_s25 = int_to_ptr.vmem [resolvable:$true] %s33_s25  ;;  %s22_s27 = int_to_ptr.vmem [resolvable:$true] %s21_s27 }
   0x5   :  { %s562_s28 = scalar_lea.vmem %s34_s25, 128  ;;  %p567_p1 = scmp.lt.s32.totalorder %s34_s25, %s34_s25 }
   0x6   :  { %p563_p0 = scmp.ne.s32.totalorder %s34_s25, %s562_s28  ;;  %p568_p2 = scmp.lt.s32.totalorder %s562_s28, %s562_s28 }
   0x8   :  { %p569_p3 = por %p568_p2, %p567_p1 }
   0xa   :  { %p570_p4 = pnand %p569_p3, %p563_p0 }
   0xc   :  { %573 = shalt.err (!%p570_p4)
}
   0xd   :  { %s664_s29 = smov 64   ;;  %s665_s30 = smov 4  }
   0xe   :  { %39 = dma.hbm_to_vmem [thread:$0]  %s770_s1, 128, %s34_s25, [#allocation6], %s664_s29, %s664_s29, %s665_s30  }
   0xf   :  { %s582_s10 = scalar_lea.vmem %s22_s27, 128  ;;  %p587_p6 = scmp.lt.s32.totalorder %s22_s27, %s22_s27 }
  0x10   :  { %p583_p5 = scmp.ne.s32.totalorder %s22_s27, %s582_s10  ;;  %p588_p7 = scmp.lt.s32.totalorder %s582_s10, %s582_s10 }
  0x12   :  { %p589_p8 = por %p588_p7, %p587_p6 }
  0x14   :  { %p590_p9 = pnand %p589_p8, %p583_p5 }
  0x16   :  { %593 = shalt.err (!%p590_p9)
}
  0x17   :  { %27 = dma.hbm_to_vmem [thread:$0]  %s769_s0, 128, %s22_s27, [#allocation3], %s664_s29, %s664_s29, %s665_s30  }
  0x18   :  { %s666_s13 = smov [#allocation7]   ;;  %s667_s15 = smov [#allocation8]  }
  0x19   :  { %s47_s14 = sshll.u32 %s666_s13, 4  ;;  %s61_s16 = sshll.u32 %s667_s15, 4  ;;  %s48_s14 = int_to_ptr.vmem [resolvable:$true] %s47_s14  ;;  %s62_s16 = int_to_ptr.vmem [resolvable:$true] %s61_s16 }
  0x1a   :  { %s602_s1 = scalar_lea.vmem %s48_s14, 1024  ;;  %p607_p11 = scmp.lt.s32.totalorder %s48_s14, %s48_s14 }
  0x1b   :  { %p603_p10 = scmp.ne.s32.totalorder %s48_s14, %s602_s1  ;;  %p608_p12 = scmp.lt.s32.totalorder %s602_s1, %s602_s1 }
  0x1d   :  { %p609_p13 = por %p608_p12, %p607_p11 }
  0x1f   :  { %p610_p0 = pnand %p609_p13, %p603_p10 }
  0x21   :  { %613 = shalt.err (!%p610_p0)
}
  0x22   :  { %53 = dma.hbm_to_vmem [thread:$0]  %s772_s3, 1024, %s48_s14, [#allocation6], %s664_s29, %s664_s29, %s665_s30  }
  0x23   :  { %s622_s0 = scalar_lea.vmem %s62_s16, 1024  ;;  %p627_p2 = scmp.lt.s32.totalorder %s62_s16, %s62_s16 }
  0x24   :  { %p623_p1 = scmp.ne.s32.totalorder %s62_s16, %s622_s0  ;;  %p628_p3 = scmp.lt.s32.totalorder %s622_s0, %s622_s0 }
  0x26   :  { %p629_p4 = por %p628_p3, %p627_p2 }
  0x28   :  { %p630_p5 = pnand %p629_p4, %p623_p1 }
  0x2a   :  { %633 = shalt.err (!%p630_p5)
}
  0x2b   :  { %67 = dma.hbm_to_vmem [thread:$0]  %s774_s5, 1024, %s62_s16, [#allocation9], %s664_s29, %s664_s29, %s665_s30  }
  0x2c   :  { %654 = dma.done.wait [#allocation3], 128  }
  0x2d   :  { %655 = vsyncadd [#allocation3], 4294967168 }
  0x2e   :  { %656 = dma.done.wait [#allocation6], 1152  }
  0x2f   :  { %657 = vsyncadd [#allocation6], 4294966144 }
  0x30   :  { %658 = dma.done.wait [#allocation9], 1024  }
  0x31   :  { %659 = vsyncadd [#allocation9], 4294966272  ;;  %v668_v0 = vmov 0.0   ;;  %vm669_vm0 = vmmov 0   ;;  %v528_v1 = vld [vmem:[#allocation5] sm:$0xff]   ;;  %v529_v2 = vld [vmem:[#allocation2] sm:$0xff]   ;;  %v380_v39 = vlaneseq }
  0x32   :  { %471 = vmatprep.subr.bf16.mxu0 %v668_v0  ;;  %473 = vmatprep.mubr.msk.bf16.mxu0 %vm669_vm0, %v668_v0  ;;  %vm105_vm1 = vcmask 130048   ;;  %v530_v3 = vld [vmem:[#allocation7 + $0x38] sm:$0xff]   ;;  %v531_v4 = vld [vmem:[#allocation7 + $0x30] sm:$0xff]   ;;  %v532_v5 = vld [vmem:[#allocation7 + $0x28] sm:$0xff]  }
  0x33   :  { %477 = vmatprep.subr.bf16.mxu1 %v668_v0  ;;  %493 = vmatprep.mubr.msk.bf16.mxu1 %vm669_vm0, %v668_v0  ;;  %v533_v6 = vld [vmem:[#allocation7 + $0x20] sm:$0xff]   ;;  %v534_v7 = vld [vmem:[#allocation7 + $0x18] sm:$0xff]   ;;  %v535_v8 = vld [vmem:[#allocation7 + $0x10] sm:$0xff]   ;;  %v381_v40 = vand.u32 127, %v380_v39 }
  0x34   :  { %472 = vmatpush3.bf16.msra.mxu0 %v528_v1  ;;  %478 = vmatpush3.bf16.msra.mxu1 %v530_v3  ;;  %v536_v9 = vld [vmem:[#allocation7 + $0x8] sm:$0xff]   ;;  %v537_v10 = vld [vmem:[#allocation7] sm:$0xff]   ;;  %v538_v11 = vld [vmem:[#allocation8 + $0x38] sm:$0xff]  }
  0x35   :  { %497 = vmatprep.subr.bf16.mxu0 %v668_v0  ;;  %479 = vmatprep.subr.bf16.mxu1 %v668_v0  ;;  %v539_v12 = vld [vmem:[#allocation8 + $0x30] sm:$0xff]   ;;  %v540_v13 = vld [vmem:[#allocation8 + $0x28] sm:$0xff]   ;;  %v541_v14 = vld [vmem:[#allocation8 + $0x20] sm:$0xff]   ;;  %vm403_vm2 = vcmp.eq.s32.totalorder %v381_v40, 4  ;;  %vm382_vm3 = vcmp.lt.s32.totalorder %v381_v40, 4 }
  0x36   :  { %v542_v15 = vld [vmem:[#allocation8 + $0x18] sm:$0xff]   ;;  %v429_v16 = vld [vmem:[%s771_s2] ss:$0 sm:$0xff]  ;;  %v544_v27 = vld [vmem:[#allocation8 + $0x8] sm:$0xff]  }
  0x37   :  { %474 = vmatmul.mubr.msk.bf16.vlgmr.msra.gmra.mxu0 %vm105_vm1, %v529_v2  ;;  %v543_v26 = vld [vmem:[#allocation8 + $0x10] sm:$0xff]   ;;  %v545_v28 = vld [vmem:[#allocation8] sm:$0xff]  }
  0x38   :  { %513 = vmatprep.mubr.msk.bf16.mxu0 %vm669_vm0, %v668_v0  ;;  %480 = vmatpush3.bf16.msra.mxu1 %v531_v4  ;;  %v433_v29 = vld [vmem:[%s773_s4] ss:$0 sm:$0xff]  ;;  %s670_s4 = smov [#allocation10]  }
  0x39   :  { %481 = vmatprep.subr.bf16.mxu1 %v668_v0  ;;  %498 = vmatpush3.bf16.msra.mxu0 %v538_v11  ;;  %v442_v41 = vld [vmem:[%s775_s6] ss:$0 sm:$0xff]  ;;  %s415_s6 = sshll.u32 %s670_s4, 4  ;;  %s416_s6 = int_to_ptr.vmem [resolvable:$true] %s415_s6 }
  0x3a   :  { %499 = vmatprep.subr.bf16.mxu0 %v668_v0  ;;  %s634_s24 = scalar_lea.vmem %s416_s6, 256  ;;  %p639_p7 = scmp.lt.s32.totalorder %s416_s6, %s416_s6 }
  0x3b   :  { %p635_p6 = scmp.ne.s32.totalorder %s416_s6, %s634_s24  ;;  %p640_p8 = scmp.lt.s32.totalorder %s634_s24, %s634_s24 }
  0x3c   :  { %482 = vmatpush3.bf16.msra.mxu1 %v532_v5 }
  0x3d   :  { %483 = vmatprep.subr.bf16.mxu1 %v668_v0  ;;  %500 = vmatpush3.bf16.msra.mxu0 %v539_v12  ;;  %p641_p9 = por %p640_p8, %p639_p7 }
  0x3e   :  { %501 = vmatprep.subr.bf16.mxu0 %v668_v0 }
  0x3f   :  { %p642_p10 = pnand %p641_p9, %p635_p6 }
  0x40   :  { %484 = vmatpush3.bf16.msra.mxu1 %v533_v6 }
  0x41   :  { %485 = vmatprep.subr.bf16.mxu1 %v668_v0  ;;  %502 = vmatpush3.bf16.msra.mxu0 %v540_v13 }
  0x42   :  { %503 = vmatprep.subr.bf16.mxu0 %v668_v0 }
  0x44   :  { %486 = vmatpush3.bf16.msra.mxu1 %v534_v7 }
  0x45   :  { %487 = vmatprep.subr.bf16.mxu1 %v668_v0  ;;  %504 = vmatpush3.bf16.msra.mxu0 %v541_v14 }
  0x46   :  { %505 = vmatprep.subr.bf16.mxu0 %v668_v0 }
  0x48   :  { %488 = vmatpush3.bf16.msra.mxu1 %v535_v8 }
  0x49   :  { %489 = vmatprep.subr.bf16.mxu1 %v668_v0  ;;  %506 = vmatpush3.bf16.msra.mxu0 %v542_v15 }
  0x4a   :  { %507 = vmatprep.subr.bf16.mxu0 %v668_v0 }
  0x4c   :  { %490 = vmatpush3.bf16.msra.mxu1 %v536_v9 }
  0x4d   :  { %491 = vmatprep.subr.bf16.mxu1 %v668_v0  ;;  %508 = vmatpush3.bf16.msra.mxu0 %v543_v26 }
  0x4e   :  { %509 = vmatprep.subr.bf16.mxu0 %v668_v0 }
  0x50   :  { %492 = vmatpush3.bf16.msra.mxu1 %v537_v10 }
  0x51   :  { %510 = vmatpush3.bf16.msra.mxu0 %v544_v27 }
  0x52   :  { %511 = vmatprep.subr.bf16.mxu0 %v668_v0 }
  0x55   :  { %512 = vmatpush3.bf16.msra.mxu0 %v545_v28 }
  0xf7   :  { %v143_v17 = vpop.f32.mrf.mxu0 }
  0xf8   :  { %v144_v19 = vadd.f32 %v429_v16, %v143_v17 }
  0xf9   :  { %v475_v18 = vpop.f32.mrf.mxu0 }
  0xfa   :  { %v150_v23 = vmax.f32 %v144_v19, 0.0 }
  0xfb   :  { %v146_v20 = vpop.f32.mrf.mxu0 }
  0xfc   :  { %v147_v21 = vadd.f32 %v429_v16, %v146_v20 }
  0xfd   :  { %v476_v22 = vpop.f32.mrf.mxu0 }
  0xfe   :  { %v151_v24 = vmax.f32 %v147_v21, 0.0 }
 0x100   :  { %v152_v25 = vpack.c.bf16 %v151_v24, %v150_v23 }
 0x102   :  { %494 = vmatmul.mubr.bf16.vlgmr.msra.gmra.mxu1 %v152_v25 }
 0x1c2   :  { %v258_v30 = vpop.f32.mrf.mxu1 }
 0x1c3   :  { %v259_v32 = vadd.f32 %v433_v29, %v258_v30 }
 0x1c4   :  { %v495_v31 = vpop.f32.mrf.mxu1 }
 0x1c5   :  { %v265_v36 = vmax.f32 %v259_v32, 0.0 }
 0x1c6   :  { %v261_v33 = vpop.f32.mrf.mxu1 }
 0x1c7   :  { %v262_v34 = vadd.f32 %v433_v29, %v261_v33 }
 0x1c8   :  { %v496_v35 = vpop.f32.mrf.mxu1 }
 0x1c9   :  { %v266_v37 = vmax.f32 %v262_v34, 0.0 }
 0x1cb   :  { %v267_v38 = vpack.c.bf16 %v266_v37, %v265_v36 }
 0x1cd   :  { %514 = vmatmul.mubr.bf16.vlgmr.msra.gmra.mxu0 %v267_v38 }
 0x28d   :  { %v373_v42 = vpop.f32.mrf.mxu0 }
 0x28e   :  { %v374_v43 = vadd.f32 %v442_v41, %v373_v42 }
 0x28f   :  { %v515_v44 = vpop.f32.mrf.mxu0 }
 0x290   :  { %v404_v45 = vsel %vm403_vm2, %v374_v43, 0.0  ;;  %v383_v46 = vsel %vm382_vm3, %v374_v43, -inf }
 0x291   :  { %385 = vmax.xlane.f32.xlu0 %v383_v46  ;;  %v376_v47 = vpop.f32.mrf.mxu0 }
 0x292   :  { %v377_v48 = vadd.f32 %v442_v41, %v376_v47 }
 0x293   :  { %v516_v49 = vpop.f32.mrf.mxu0 }
 0x294   :  { %v405_v50 = vsel %vm403_vm2, %v377_v48, 0.0  ;;  %v384_v51 = vsel %vm382_vm3, %v377_v48, -inf }
 0x295   :  { %387 = vmax.xlane.f32.xlu0 %v384_v51 }
 0x31a   :  { %v386_v52 = vpop.xlane.xlu0 %385 }
 0x31b   :  { %v389_v53 = vsub.f32 %v383_v46, %v386_v52 }
 0x31d   :  { %v391_v54 = vmul.f32 1.442695, %v389_v53 }
 0x31e   :  { %v388_v55 = vpop.xlane.xlu0 %387 }
 0x31f   :  { %546 = vpow2.f32 %v391_v54  ;;  %v390_v56 = vsub.f32 %v384_v51, %v388_v55 }
 0x321   :  { %v393_v57 = vmul.f32 1.442695, %v390_v56 }
 0x323   :  { %548 = vpow2.f32 %v393_v57 }
 0x32c   :  { %v547_v58 = vpop.eup %546 }
 0x32d   :  { %395 = vadd.xlane.f32.xlu1 %v547_v58 }
 0x330   :  { %v549_v59 = vpop.eup %548 }
 0x331   :  { %397 = vadd.xlane.f32.xlu1 %v549_v59 }
 0x3b6   :  { %v396_v60 = vpop.xlane.xlu1 %395 }
 0x3b7   :  { %550 = vrcp.f32 %v396_v60 }
 0x3ba   :  { %v398_v61 = vpop.xlane.xlu1 %397 }
 0x3bb   :  { %552 = vrcp.f32 %v398_v61 }
 0x3c4   :  { %v551_v62 = vpop.eup %550 }
 0x3c5   :  { %v400_v63 = vmul.f32 %v551_v62, %v547_v58 }
 0x3c7   :  { %v406_v0 = vadd.f32 %v404_v45, %v400_v63 }
 0x3c8   :  { %v553_v1 = vpop.eup %552 }
 0x3c9   :  { %v402_v2 = vmul.f32 %v553_v1, %v549_v59  ;;  %408 = vst [vmem:[#allocation10] sm:$0xff] %v406_v0 }
 0x3cb   :  { %v407_v3 = vadd.f32 %v405_v50, %v402_v2 }
 0x3cd   :  { %409 = vst [vmem:[#allocation10 + $0x8] sm:$0xff] %v407_v3 }
 0x3ce   :  { %645 = shalt.err (!%p642_p10)
}
 0x3cf   :  { %s671_s25 = smov 128   ;;  %s672_s26 = smov 8  }
 0x3d0   :  { %421 = dma.vmem_to_hbm [thread:$0]  %s416_s6, 256, %s776_s7, [#allocation4], %s671_s25, %s671_s25, %s672_s26  }
 0x3d1   :  { %660 = dma.done.wait [#allocation4], 256  }
 0x3d2   :  { %661 = vsyncadd [#allocation4], 4294967040 }
 0x3d3   :  { %425 = vsyncpa [#allocation3], 1 }
 0x3d4   :  { %426 = vsyncpa [#allocation6], 1 }
 0x3d5   :  { %427 = vsyncpa [#allocation9], 1 }
 0x3d6   :  { %428 = vsyncpa [#allocation4], 1 }

</bundles_post_ra>
